<compile_context>
chip_gen: v7x
topology: tpu7x:2x2x1
jax: 0.10.0
libtpu: 0.0.40
codegen_flags: <defaults>
</compile_context>

<pallas_src>
import jax
import jax.numpy as jnp
from jax import lax
from jax.experimental import pallas as pl
from jax.experimental.pallas import tpu as pltpu


# ---------------------------------------------------------------------------
# helpers
# ---------------------------------------------------------------------------
def _round_up(x, m):
    return ((x + m - 1) // m) * m


def _pad2d(x, rows, cols):
    r, c = x.shape
    if (r, c) == (rows, cols):
        return x
    return jnp.pad(x, ((0, rows - r), (0, cols - c)))


_VMEM_LIMIT = 48 * 1024 * 1024  # below v7x's 64 MiB physical VMEM, above scoped defaults


# ---------------------------------------------------------------------------
# Kernel 1: edge mask (lane-dense), grid = (E tiles [parallel], V tiles [reduction])
#   ev[1, tile_e]  = sum_k  active_vars[1, tile_k] . g_vm[tile_e, tile_k]^T
#   ef[1, tile_e]  =        active_funcs[1, F]     . g_fm[tile_e, F]^T     (k == 0)
#   edge_mask[1, tile_e] = ev * ef                                         (k == last)
# ---------------------------------------------------------------------------
def _edge_mask_kernel(av_ref, gvm_ref, af_ref, gfm_ref, out_ref, ev_acc, ef_buf):
    k = pl.program_id(1)

    @pl.when(k == 0)
    def _():
        ev_acc[...] = jnp.zeros_like(ev_acc)
        # TODO(synk): the F contraction is not K-tiled (g_fm block is (tile_e, F));
        # tile it like V for extremely large function counts.
        ef_buf[...] = lax.dot_general(
            af_ref[...], gfm_ref[...], (((1,), (1,)), ((), ())),
            preferred_element_type=jnp.float32)

    ev_acc[...] += lax.dot_general(
        av_ref[...], gvm_ref[...], (((1,), (1,)), ((), ())),
        preferred_element_type=jnp.float32)

    @pl.when(k == pl.num_programs(1) - 1)
    def _():
        out_ref[...] = ev_acc[...] * ef_buf[...]


def edge_mask_pallas(g_vm, g_fm, active_vars, active_funcs, *, tile_e=512, tile_k=512):
    E, V = g_vm.shape
    _, F = g_fm.shape

    tile_e = min(tile_e, _round_up(E, 128))
    tile_k = min(tile_k, _round_up(V, 128))
    e_pad = _round_up(E, tile_e)
    v_pad = _round_up(V, tile_k)
    f_pad = _round_up(F, 128)

    gvm = _pad2d(g_vm.astype(jnp.bfloat16), e_pad, v_pad)
    gfm = _pad2d(g_fm.astype(jnp.bfloat16), e_pad, f_pad)
    av = _pad2d(active_vars.astype(jnp.bfloat16).reshape(1, V), 1, v_pad)
    af = _pad2d(active_funcs.astype(jnp.bfloat16).reshape(1, F), 1, f_pad)

    out = pl.pallas_call(
        _edge_mask_kernel,
        out_shape=jax.ShapeDtypeStruct((1, e_pad), jnp.float32),
        grid_spec=pltpu.PrefetchScalarGridSpec(
            num_scalar_prefetch=0,
            grid=(e_pad // tile_e, v_pad // tile_k),
            in_specs=[
                pl.BlockSpec((1, tile_k), lambda i, k: (0, k)),
                pl.BlockSpec((tile_e, tile_k), lambda i, k: (i, k)),
                pl.BlockSpec((1, f_pad), lambda i, k: (0, 0)),
                pl.BlockSpec((tile_e, f_pad), lambda i, k: (i, 0)),
            ],
            out_specs=pl.BlockSpec((1, tile_e), lambda i, k: (0, i)),
            scratch_shapes=[pltpu.VMEM((1, tile_e), jnp.float32),
                            pltpu.VMEM((1, tile_e), jnp.float32)],
        ),
        compiler_params=pltpu.CompilerParams(
            dimension_semantics=("parallel", "arbitrary"),
            vmem_limit_bytes=_VMEM_LIMIT),
    )(av, gvm, af, gfm)
    # back to the PyTorch (E, 1) column convention.
    return out[0, :E].reshape(E, 1)


# ---------------------------------------------------------------------------
# Kernel 2: predictor head (fused aggregation + Perceptron), lane-dense output.
# grid = (V tiles [parallel], E tiles [reduction])
#   h^T[H, tile_v]  += edge_hidden[tile_e, H]^T-contract-g_vm[tile_e, tile_v]
#   z^T[C, tile_v]   = relu(W1^T @ h^T + b1)
#   p[1, tile_v]     = sigmoid(sum_C(z^T * w2) + b2)      (final layer on VPU/XLU)
# ---------------------------------------------------------------------------
def _predictor_kernel(eh_ref, gvm_ref, w1t_ref, b1_ref, w2_ref, b2_ref,
                      out_ref, h_acc):
    k = pl.program_id(1)

    @pl.when(k == 0)
    def _():
        h_acc[...] = jnp.zeros_like(h_acc)

    # contract the edge axis of both operands -> (H, tile_v); no host transpose of g_vm.
    h_acc[...] += lax.dot_general(
        eh_ref[...], gvm_ref[...], (((0,), (0,)), ((), ())),
        preferred_element_type=jnp.float32)

    @pl.when(k == pl.num_programs(1) - 1)
    def _():
        h = h_acc[...].astype(jnp.bfloat16)                      # (H, tile_v)
        z = jnp.dot(w1t_ref[...], h,
                    preferred_element_type=jnp.float32)          # (C, tile_v)
        z = jnp.maximum(z + b1_ref[...], 0.0)
        # final (C -> 1) layer as broadcast-mul + sublane reduce (avoids a 1-row MXU op)
        logit = jnp.sum(z * w2_ref[...], axis=0, keepdims=True) + b2_ref[...]
        out_ref[...] = jax.nn.sigmoid(logit)                     # (1, tile_v)


def predictor_pallas(g_vm, edge_hidden, w1_t, b1_col, w2_col, b2,
                     *, tile_v=256, tile_e=512):
    E, V = g_vm.shape
    _, H = edge_hidden.shape
    C = w1_t.shape[0]

    tile_v = min(tile_v, _round_up(V, 128))
    tile_e = min(tile_e, _round_up(E, 128))
    v_pad = _round_up(V, tile_v)
    e_pad = _round_up(E, tile_e)

    gvm = _pad2d(g_vm.astype(jnp.bfloat16), e_pad, v_pad)
    eh = _pad2d(edge_hidden.astype(jnp.bfloat16), e_pad, H)

    out = pl.pallas_call(
        _predictor_kernel,
        out_shape=jax.ShapeDtypeStruct((1, v_pad), jnp.float32),
        grid_spec=pltpu.PrefetchScalarGridSpec(
            num_scalar_prefetch=0,
            grid=(v_pad // tile_v, e_pad // tile_e),
            in_specs=[
                pl.BlockSpec((tile_e, H), lambda i, k: (k, 0)),
                pl.BlockSpec((tile_e, tile_v), lambda i, k: (k, i)),
                pl.BlockSpec((C, H), lambda i, k: (0, 0)),
                pl.BlockSpec((C, 1), lambda i, k: (0, 0)),
                pl.BlockSpec((C, 1), lambda i, k: (0, 0)),
                pl.BlockSpec((1, 1), lambda i, k: (0, 0)),
            ],
            out_specs=pl.BlockSpec((1, tile_v), lambda i, k: (0, i)),
            scratch_shapes=[pltpu.VMEM((H, tile_v), jnp.float32)],
        ),
        compiler_params=pltpu.CompilerParams(
            dimension_semantics=("parallel", "arbitrary"),
            vmem_limit_bytes=_VMEM_LIMIT),
    )(eh, gvm, w1_t, b1_col, w2_col, b2)
    return out[0, :V].reshape(V, 1)


# ---------------------------------------------------------------------------
# Module wrapper (training-path defaults of the PyTorch reference)
# ---------------------------------------------------------------------------
class PropagatorDecimatorSolverPallas:
    def __init__(self, hidden_dimension=32, classifier_dimension=16, seed=0):
        self._hidden = hidden_dimension
        self._classifier = classifier_dimension
        self._predict_dimension = 1
        k1, k2 = jax.random.split(jax.random.PRNGKey(seed))
        w1 = jax.random.normal(k1, (hidden_dimension, classifier_dimension),
                               jnp.float32) * 0.1
        w2 = jax.random.normal(k2, (classifier_dimension, 1), jnp.float32) * 0.1
        # util.Perceptron(hidden, classifier, 1) parameters, stored in the layouts
        # the fused predictor kernel consumes (tiny, transposed once on host).
        self.w1_t = jnp.asarray(w1.T, jnp.bfloat16)                 # (C, H)
        self.b1_col = jnp.zeros((classifier_dimension, 1), jnp.float32)
        self.w2_col = jnp.asarray(w2, jnp.float32)                  # (C, 1)
        self.b2 = jnp.zeros((1, 1), jnp.float32)
        self._global_step = jnp.zeros((1,), jnp.float32)

    def forward(self, init_state, sat_problem, is_training=True, iteration_num=1):
        propagator_state, decimator_state = init_state
        g_vm = sat_problem["graph_mask_vm"]          # (E, V)
        g_fm = sat_problem["graph_mask_fm"]          # (E, F)
        active_vars = sat_problem["active_variables"]    # (V, 1)
        active_funcs = sat_problem["active_functions"]   # (F, 1)
        edge_num = g_vm.shape[0]

        # TODO(synk): SurveyAggregator propagator update is not defined in the
        # provided source; propagator/decimator states pass through unchanged.

        # edge_mask is loop-invariant on this path -> compute once (hoisted).
        edge_mask = edge_mask_pallas(g_vm, g_fm, active_vars, active_funcs)
        sat_problem["edge_mask"] = edge_mask
        # Single host sync for the structural tuple-append decision (the append
        # changes the pytree, so it cannot live under lax.cond / jit).
        mask_deficit = bool(jnp.sum(edge_mask) < edge_num)

        for _ in range(iteration_num):
            if mask_deficit and len(decimator_state) < 3:
                decimator_state = decimator_state + (edge_mask,)

        # Predictor: edge->variable aggregation fused with the Perceptron head.
        # TODO(synk): full SurveyNeuralPredictor (agg/func MLPs) is not defined in
        # the provided source; only the documented Perceptron head is modelled.
        variable_prediction = predictor_pallas(
            g_vm, decimator_state[0], self.w1_t, self.b1_col, self.w2_col, self.b2)

        # TODO(synk): util.update_solution / _local_search / _deduplicate are
        # inactive on the training path and their util.* sources are not given.
        prediction = (variable_prediction, None)
        return prediction, (propagator_state, decimator_state)


# ---------------------------------------------------------------------------
# Example run
# ---------------------------------------------------------------------------
if __name__ == "__main__":
    E, V, F, H, C = 256, 128, 64, 32, 16

    key = jax.random.PRNGKey(0)
    k_edge, k_prop = jax.random.split(key)

    # Deterministic bipartite incidence masks: edge e touches variable e % V
    # and function e % F.
    edge_ids = jnp.arange(E)
    g_vm = jnp.zeros((E, V), jnp.float32).at[edge_ids, edge_ids % V].set(1.0)
    g_fm = jnp.zeros((E, F), jnp.float32).at[edge_ids, edge_ids % F].set(1.0)

    active_vars = jnp.ones((V, 1), jnp.float32).at[0:4, 0].set(0.0)  # a few inactive
    active_funcs = jnp.ones((F, 1), jnp.float32)

    sat_problem = {
        "graph_mask_vm": g_vm,
        "graph_mask_fm": g_fm,
        "active_variables": active_vars,
        "active_functions": active_funcs,
        "edge_mask": None,
    }

    init_decimator_state = (jax.random.normal(k_edge, (E, H), jnp.float32),)
    init_propagator_state = (jax.random.normal(k_prop, (E, H), jnp.float32),)

    solver = PropagatorDecimatorSolverPallas(hidden_dimension=H,
                                             classifier_dimension=C, seed=0)
    prediction, (prop_state, dec_state) = solver.forward(
        (init_propagator_state, init_decimator_state),
        sat_problem, is_training=True, iteration_num=2)

    jax.block_until_ready(prediction[0])
    jax.block_until_ready(sat_problem["edge_mask"])

    assert prediction[0].shape == (V, 1)
    assert sat_problem["edge_mask"].shape == (E, 1)
    assert len(dec_state) == 3  # edge_mask appended (some variables inactive)

    # Reference check (pure XLA, f32) with bf16-appropriate tolerance.
    ref_mask = jnp.dot(g_vm, active_vars) * jnp.dot(g_fm, active_funcs)
    assert bool(jnp.allclose(sat_problem["edge_mask"], ref_mask, atol=1e-5)), \
        "edge_mask mismatch"

    h_var = jnp.dot(g_vm.T, init_decimator_state[0])
    z = jnp.maximum(jnp.dot(h_var, solver.w1_t.astype(jnp.float32).T)
                    + solver.b1_col.T, 0.0)
    ref_pred = jax.nn.sigmoid(jnp.dot(z, solver.w2_col) + solver.b2)
    assert bool(jnp.allclose(prediction[0], ref_pred, atol=3e-2)), \
        "prediction mismatch"

    print("KERNEL_OK")
</pallas_src>

<mosaic_0001>
module attributes {stable_mosaic.version = 11 : i64} {
  func.func @_edge_mask_kernel(%arg0: i32, %arg1: i32, %arg2: memref<1x128xbf16, #tpu.memory_space<vmem>>, %arg3: memref<256x128xbf16, #tpu.memory_space<vmem>>, %arg4: memref<1x128xbf16, #tpu.memory_space<vmem>>, %arg5: memref<256x128xbf16, #tpu.memory_space<vmem>>, %arg6: memref<1x256xf32, #tpu.memory_space<vmem>>, %arg7: memref<1x256xf32, #tpu.memory_space<vmem>>, %arg8: memref<1x256xf32, #tpu.memory_space<vmem>>) attributes {dimension_semantics = [#tpu.dimension_semantics<parallel>, #tpu.dimension_semantics<arbitrary>], iteration_bounds = array<i64: 1, 1>, scalar_prefetch = 0 : i64, scratch_operands = 2 : i64, tpu.core_type = #tpu.core_type<tc>, window_params = [{transform_indices = @transform_0, window_bounds = array<i64: 1, 128>}, {transform_indices = @transform_1, window_bounds = array<i64: 256, 128>}, {pipeline_mode = #tpu.pipeline_mode<synchronous>, transform_indices = @transform_2, window_bounds = array<i64: 1, 128>}, {transform_indices = @transform_3, window_bounds = array<i64: 256, 128>}, {transform_indices = @transform_4, window_bounds = array<i64: 1, 256>}]} {
    %c0_i32 = arith.constant 0 : i32
    %0 = arith.cmpi eq, %arg1, %c0_i32 : i32
    %1 = arith.extui %0 : i1 to i32
    %c0_i32_0 = arith.constant 0 : i32
    %2 = arith.cmpi ne, %1, %c0_i32_0 : i32
    scf.if %2 {
      %cst_10 = arith.constant 0.000000e+00 : f32
      %12 = vector.broadcast %cst_10 : f32 to vector<1x256xf32>
      %c0_11 = arith.constant 0 : index
      %c0_12 = arith.constant 0 : index
      %13 = vector.load %arg7[%c0_11, %c0_12] : memref<1x256xf32, #tpu.memory_space<vmem>>, vector<1x256xf32>
      tpu.vector_store %arg7[%c0_11, %c0_12], %12 {strides = array<i32>} : memref<1x256xf32, #tpu.memory_space<vmem>>, vector<1x256xf32>,
      %c0_13 = arith.constant 0 : index
      %c0_14 = arith.constant 0 : index
      %14 = vector.load %arg4[%c0_13, %c0_14] : memref<1x128xbf16, #tpu.memory_space<vmem>>, vector<1x128xbf16>
      %c0_15 = arith.constant 0 : index
      %c0_16 = arith.constant 0 : index
      %15 = vector.load %arg5[%c0_15, %c0_16] : memref<256x128xbf16, #tpu.memory_space<vmem>>, vector<256x128xbf16>
      %cst_17 = arith.constant dense<0.000000e+00> : vector<1x256xf32>
      %16 = tpu.matmul %14, %15, %cst_17 {dimension_numbers = #tpu.dot_dimension_numbers<[1], [1], [0], [0], [0, 0, 1, 0], [], []>} : vector<1x128xbf16>, vector<256x128xbf16>, vector<1x256xf32> -> vector<1x256xf32>
      %c0_18 = arith.constant 0 : index
      %c0_19 = arith.constant 0 : index
      %17 = vector.load %arg8[%c0_18, %c0_19] : memref<1x256xf32, #tpu.memory_space<vmem>>, vector<1x256xf32>
      tpu.vector_store %arg8[%c0_18, %c0_19], %16 {strides = array<i32>} : memref<1x256xf32, #tpu.memory_space<vmem>>, vector<1x256xf32>,
    } else {
    }
    %c0 = arith.constant 0 : index
    %c0_1 = arith.constant 0 : index
    %3 = vector.load %arg7[%c0, %c0_1] : memref<1x256xf32, #tpu.memory_space<vmem>>, vector<1x256xf32>
    %c0_2 = arith.constant 0 : index
    %c0_3 = arith.constant 0 : index
    %4 = vector.load %arg2[%c0_2, %c0_3] : memref<1x128xbf16, #tpu.memory_space<vmem>>, vector<1x128xbf16>
    %c0_4 = arith.constant 0 : index
    %c0_5 = arith.constant 0 : index
    %5 = vector.load %arg3[%c0_4, %c0_5] : memref<256x128xbf16, #tpu.memory_space<vmem>>, vector<256x128xbf16>
    %cst = arith.constant dense<0.000000e+00> : vector<1x256xf32>
    %6 = tpu.matmul %4, %5, %cst {dimension_numbers = #tpu.dot_dimension_numbers<[1], [1], [0], [0], [0, 0, 1, 0], [], []>} : vector<1x128xbf16>, vector<256x128xbf16>, vector<1x256xf32> -> vector<1x256xf32>
    %7 = arith.addf %3, %6 : vector<1x256xf32>
    %c0_6 = arith.constant 0 : index
    %c0_7 = arith.constant 0 : index
    %8 = vector.load %arg7[%c0_6, %c0_7] : memref<1x256xf32, #tpu.memory_space<vmem>>, vector<1x256xf32>
    tpu.vector_store %arg7[%c0_6, %c0_7], %7 {strides = array<i32>} : memref<1x256xf32, #tpu.memory_space<vmem>>, vector<1x256xf32>,
    %c0_i32_8 = arith.constant 0 : i32
    %9 = arith.cmpi eq, %arg1, %c0_i32_8 : i32
    %10 = arith.extui %9 : i1 to i32
    %c0_i32_9 = arith.constant 0 : i32
    %11 = arith.cmpi ne, %10, %c0_i32_9 : i32
    scf.if %11 {
      %c0_10 = arith.constant 0 : index
      %c0_11 = arith.constant 0 : index
      %12 = vector.load %arg7[%c0_10, %c0_11] : memref<1x256xf32, #tpu.memory_space<vmem>>, vector<1x256xf32>
      %c0_12 = arith.constant 0 : index
      %c0_13 = arith.constant 0 : index
      %13 = vector.load %arg8[%c0_12, %c0_13] : memref<1x256xf32, #tpu.memory_space<vmem>>, vector<1x256xf32>
      %14 = arith.mulf %12, %13 : vector<1x256xf32>
      %c0_14 = arith.constant 0 : index
      %c0_15 = arith.constant 0 : index
      %15 = vector.load %arg6[%c0_14, %c0_15] : memref<1x256xf32, #tpu.memory_space<vmem>>, vector<1x256xf32>
      tpu.vector_store %arg6[%c0_14, %c0_15], %14 {strides = array<i32>} : memref<1x256xf32, #tpu.memory_space<vmem>>, vector<1x256xf32>,
    } else {
    }
    return
  }
  func.func @transform_0(%arg0: i32, %arg1: i32) -> (i32, i32) {
    %c0_i32 = arith.constant 0 : i32
    %c0_i32_0 = arith.constant 0 : i32
    return %c0_i32, %arg1 : i32, i32
  }
  func.func @transform_1(%arg0: i32, %arg1: i32) -> (i32, i32) {
    %c0_i32 = arith.constant 0 : i32
    return %arg0, %arg1 : i32, i32
  }
  func.func @transform_2(%arg0: i32, %arg1: i32) -> (i32, i32) {
    %c0_i32 = arith.constant 0 : i32
    %c0_i32_0 = arith.constant 0 : i32
    %c0_i32_1 = arith.constant 0 : i32
    return %c0_i32, %c0_i32_0 : i32, i32
  }
  func.func @transform_3(%arg0: i32, %arg1: i32) -> (i32, i32) {
    %c0_i32 = arith.constant 0 : i32
    %c0_i32_0 = arith.constant 0 : i32
    return %arg0, %c0_i32 : i32, i32
  }
  func.func @transform_4(%arg0: i32, %arg1: i32) -> (i32, i32) {
    %c0_i32 = arith.constant 0 : i32
    %c0_i32_0 = arith.constant 0 : i32
    return %c0_i32, %arg0 : i32, i32
  }
}

</mosaic_0001>

<bundles_post_ra>
// kernel: tpu_custom_call.1
= control target key start
LH: loop header
LB: loop body
LE: loop exit
PB: predicated region body
PF: predicated region fallthrough
CT: control target
= control target key end

     0   :  { %9 = vsyncpa [#allocation5], 0  ;;  %s778_s0 = inlined_call_operand.hbm [shape: bf16[1,128], index: 0, kind: input, shape index: {}]   ;;  %s779_s1 = inlined_call_operand.hbm [shape: bf16[256,128], index: 1, kind: input, shape index: {}]   ;;  %s780_s2 = inlined_call_operand.vmem [shape: bf16[1,128], index: 2, kind: input, shape index: {}]   ;;  %s781_s3 = inlined_call_operand.hbm [shape: bf16[256,128], index: 3, kind: input, shape index: {}]   ;;  %s782_s4 = inlined_call_operand.hbm [shape: f32[1,256], index: 4, kind: output, shape index: {}]  }
   0x1   :  { %10 = vsyncpa [#allocation8], 0 }
   0x2   :  { %11 = vsyncpa [#allocation6], 0  ;;  %s676_s15 = smov [#allocation7]   ;;  %s582_s19 = scalar_lea.hbm %s779_s1, 2048 }
   0x3   :  { %s27_s16 = sshll.u32 %s676_s15, 4  ;;  %p583_p0 = scmp.ne.s32.totalorder %s779_s1, %s582_s19  ;;  %s28_s16 = int_to_ptr.vmem [resolvable:$true] %s27_s16 }
   0x4   :  { %p586_p1 = scmp.lt.u32.totalorder %s582_s19, %s779_s1 }
   0x6   :  { %p588_p2 = pnand %p586_p1, %p583_p0 }
   0x8   :  { %591 = shalt.err (!%p588_p2)
}
   0x9   :  { %s592_s24 = scalar_lea.vmem %s28_s16, 2048  ;;  %p597_p4 = scmp.lt.s32.totalorder %s28_s16, %s28_s16 }
   0xa   :  { %p593_p3 = scmp.ne.s32.totalorder %s28_s16, %s592_s24  ;;  %p598_p5 = scmp.lt.s32.totalorder %s592_s24, %s592_s24 }
   0xc   :  { %p599_p6 = por %p598_p5, %p597_p4 }
   0xe   :  { %p600_p7 = pnand %p599_p6, %p593_p3 }
  0x10   :  { %603 = shalt.err (!%p600_p7)
}
  0x11   :  { %s677_s25 = smov 64   ;;  %s678_s26 = smov 4  }
  0x12   :  { %33 = dma.hbm_to_vmem [thread:$0]  %s779_s1, 2048, %s28_s16, [#allocation8], %s677_s25, %s677_s25, %s678_s26  }
  0x13   :  { %s679_s29 = smov [#allocation4]   ;;  %s680_s5 = smov [#allocation9]  }
  0x14   :  { %s18_s30 = sshll.u32 %s679_s29, 4  ;;  %s41_s6 = sshll.u32 %s680_s5, 4  ;;  %s19_s30 = int_to_ptr.vmem [resolvable:$true] %s18_s30  ;;  %s42_s6 = int_to_ptr.vmem [resolvable:$true] %s41_s6 }
  0x15   :  { %s604_s9 = scalar_lea.hbm %s778_s0, 16 }
  0x16   :  { %p605_p8 = scmp.ne.s32.totalorder %s778_s0, %s604_s9  ;;  %p608_p9 = scmp.lt.u32.totalorder %s604_s9, %s778_s0 }
  0x18   :  { %p610_p10 = pnand %p608_p9, %p605_p8 }
  0x1a   :  { %613 = shalt.err (!%p610_p10)
}
  0x1b   :  { %s614_s1 = scalar_lea.vmem %s19_s30, 16  ;;  %s618_s14 = scalar_lea.vmem %s19_s30, 32 }
  0x1c   :  { %p615_p11 = scmp.ne.s32.totalorder %s19_s30, %s614_s1  ;;  %p619_p12 = scmp.lt.s32.totalorder %s19_s30, %s19_s30 }
  0x1d   :  { %p620_p13 = scmp.lt.s32.totalorder %s618_s14, %s614_s1 }
  0x1f   :  { %p621_p0 = por %p620_p13, %p619_p12 }
  0x21   :  { %p622_p1 = pnand %p621_p0, %p615_p11 }
  0x23   :  { %625 = shalt.err (!%p622_p1)
}
  0x24   :  { %21 = dma.hbm_to_vmem [thread:$0]  %s778_s0, 16, %s19_s30, [#allocation5]  }
  0x25   :  { %s626_s19 = scalar_lea.hbm %s781_s3, 2048 }
  0x26   :  { %p627_p2 = scmp.ne.s32.totalorder %s781_s3, %s626_s19  ;;  %p630_p3 = scmp.lt.u32.totalorder %s626_s19, %s781_s3 }
  0x28   :  { %p632_p4 = pnand %p630_p3, %p627_p2 }
  0x2a   :  { %635 = shalt.err (!%p632_p4)
}
  0x2b   :  { %s636_s24 = scalar_lea.vmem %s42_s6, 2048  ;;  %p641_p6 = scmp.lt.s32.totalorder %s42_s6, %s42_s6 }
  0x2c   :  { %p637_p5 = scmp.ne.s32.totalorder %s42_s6, %s636_s24  ;;  %p642_p7 = scmp.lt.s32.totalorder %s636_s24, %s636_s24 }
  0x2e   :  { %p643_p8 = por %p642_p7, %p641_p6 }
  0x30   :  { %p644_p9 = pnand %p643_p8, %p637_p5 }
  0x32   :  { %647 = shalt.err (!%p644_p9)
}
  0x33   :  { %47 = dma.hbm_to_vmem [thread:$0]  %s781_s3, 2048, %s42_s6, [#allocation8], %s677_s25, %s677_s25, %s678_s26  }
  0x34   :  { %670 = dma.done.wait [#allocation5], 16  }
  0x35   :  { %671 = vsyncadd [#allocation5], 4294967280 }
  0x36   :  { %672 = dma.done.wait [#allocation8], 4096  }
  0x37   :  { %673 = vsyncadd [#allocation8], 4294963200  ;;  %v550_v0 = vld [vmem:[#allocation9 + $0x40] sm:$0xff]   ;;  %v554_v4 = vld [vmem:[#allocation9 + $0x48] sm:$0xff]   ;;  %v62_v34 = vlaneseq  ;;  %v681_v36 = vmov 0.0  }
  0x38   :  { %v551_v1 = vld [vmem:[#allocation7 + $0x40] sm:$0xff]   ;;  %506 = vmatprep.subr.bf16.mxu0 %v550_v0  ;;  %v555_v5 = vld [vmem:[#allocation7 + $0x48] sm:$0xff]   ;;  %v558_v8 = vld [vmem:[#allocation9 + $0x50] sm:$0xff]   ;;  %v682_v37 = vmov 1966171168  }
  0x39   :  { %v552_v2 = vld [vmem:[#allocation9] sm:$0xff]   ;;  %524 = vmatprep.subr.bf16.mxu1 %v551_v1  ;;  %v556_v6 = vld [vmem:[#allocation9 + $0x8] sm:$0xff]   ;;  %v559_v9 = vld [vmem:[#allocation7 + $0x50] sm:$0xff]   ;;  %vm754_vm0 = vcmp.lt.s32.totalorder %v62_v34, 256  ;;  %v241_v38 = vunpack.c.l.s4 %v682_v37  ;;  %v244_v40 = vshrl.u32 %v62_v34, 7 }
  0x3a   :  { %v553_v3 = vld [vmem:[#allocation7] sm:$0xff]   ;;  %507 = vmatpush3.bf16.xpose.msra.mxu0 %v552_v2  ;;  %v557_v7 = vld [vmem:[#allocation7 + $0x8] sm:$0xff]   ;;  %v560_v10 = vld [vmem:[#allocation9 + $0x10] sm:$0xff]   ;;  %66 = vst.msk [vmem:[#allocation2] sm:$0x3] %vm754_vm0, %v681_v36 }
  0x3b   :  { %525 = vmatpush3.bf16.xpose.msra.mxu1 %v553_v3  ;;  %508 = vmatprep.subr.bf16.mxu0 %v554_v4  ;;  %v561_v11 = vld [vmem:[#allocation7 + $0x10] sm:$0xff]   ;;  %v562_v12 = vld [vmem:[#allocation9 + $0x58] sm:$0xff]   ;;  %v566_v16 = vld [vmem:[#allocation9 + $0x60] sm:$0xff]   ;;  %v242_v39 = vunpack.c.0.s8 %v241_v38 }
  0x3c   :  { %526 = vmatprep.subr.bf16.mxu1 %v555_v5  ;;  %v563_v13 = vld [vmem:[#allocation7 + $0x58] sm:$0xff]   ;;  %v567_v17 = vld [vmem:[#allocation7 + $0x60] sm:$0xff]   ;;  %v570_v22 = vld [vmem:[#allocation9 + $0x68] sm:$0xff]  }
  0x3d   :  { %v564_v14 = vld [vmem:[#allocation9 + $0x18] sm:$0xff]   ;;  %v568_v18 = vld [vmem:[#allocation9 + $0x20] sm:$0xff]   ;;  %v571_v23 = vld [vmem:[#allocation7 + $0x68] sm:$0xff]   ;;  %v245_v42 = vsub.s32 %v242_v39, %v244_v40 }
  0x3e   :  { %v565_v15 = vld [vmem:[#allocation7 + $0x18] sm:$0xff]   ;;  %v569_v21 = vld [vmem:[#allocation7 + $0x20] sm:$0xff]   ;;  %v572_v24 = vld [vmem:[#allocation9 + $0x28] sm:$0xff]  }
  0x3f   :  { %v67_v19 = vld [vmem:[%s780_s2] sm:$0x1]  ;;  %v257_v20 = vld [vmem:[#allocation4] sm:$0x1]  ;;  %v573_v25 = vld [vmem:[#allocation7 + $0x28] sm:$0xff]   ;;  %s683_s2 = smov [#allocation10]  }
  0x40   :  { %522 = vmatprep.mubr.bf16.mxu0 %v67_v19  ;;  %540 = vmatprep.mubr.bf16.mxu1 %v257_v20  ;;  %v574_v26 = vld [vmem:[#allocation9 + $0x70] sm:$0xff]   ;;  %v578_v30 = vld [vmem:[#allocation9 + $0x78] sm:$0xff]   ;;  %s464_s26 = sshll.u32 %s683_s2, 4  ;;  %s465_s26 = int_to_ptr.vmem [resolvable:$true] %s464_s26 }
  0x41   :  { %v575_v27 = vld [vmem:[#allocation7 + $0x70] sm:$0xff]   ;;  %v579_v31 = vld [vmem:[#allocation7 + $0x78] sm:$0xff]   ;;  %s648_s28 = scalar_lea.vmem %s465_s26, 32  ;;  %p653_p11 = scmp.lt.s32.totalorder %s465_s26, %s465_s26 }
  0x42   :  { %509 = vmatpush3.bf16.xpose.msra.mxu0 %v556_v6  ;;  %v576_v28 = vld [vmem:[#allocation9 + $0x30] sm:$0xff]   ;;  %v580_v32 = vld [vmem:[#allocation9 + $0x38] sm:$0xff]   ;;  %p649_p10 = scmp.ne.s32.totalorder %s465_s26, %s648_s28  ;;  %p654_p12 = scmp.lt.s32.totalorder %s648_s28, %s648_s28 }
  0x43   :  { %527 = vmatpush3.bf16.xpose.msra.mxu1 %v557_v7  ;;  %510 = vmatprep.subr.bf16.mxu0 %v558_v8  ;;  %v577_v29 = vld [vmem:[#allocation7 + $0x30] sm:$0xff]   ;;  %v581_v33 = vld [vmem:[#allocation7 + $0x38] sm:$0xff]  }
  0x44   :  { %528 = vmatprep.subr.bf16.mxu1 %v559_v9  ;;  %v256_v55 = vld [vmem:[#allocation2] sm:$0x3]  ;;  %p655_p13 = por %p654_p12, %p653_p11 }
  0x46   :  { %p656_p0 = pnand %p655_p13, %p649_p10 }
  0x4a   :  { %511 = vmatpush3.bf16.xpose.msra.mxu0 %v560_v10 }
  0x4b   :  { %529 = vmatpush3.bf16.xpose.msra.mxu1 %v561_v11  ;;  %512 = vmatprep.subr.bf16.mxu0 %v562_v12 }
  0x4c   :  { %530 = vmatprep.subr.bf16.mxu1 %v563_v13 }
  0x52   :  { %513 = vmatpush3.bf16.xpose.msra.mxu0 %v564_v14 }
  0x53   :  { %531 = vmatpush3.bf16.xpose.msra.mxu1 %v565_v15  ;;  %514 = vmatprep.subr.bf16.mxu0 %v566_v16 }
  0x54   :  { %532 = vmatprep.subr.bf16.mxu1 %v567_v17 }
  0x5a   :  { %515 = vmatpush3.bf16.xpose.msra.mxu0 %v568_v18 }
  0x5b   :  { %533 = vmatpush3.bf16.xpose.msra.mxu1 %v569_v21  ;;  %516 = vmatprep.subr.bf16.mxu0 %v570_v22 }
  0x5c   :  { %534 = vmatprep.subr.bf16.mxu1 %v571_v23 }
  0x62   :  { %517 = vmatpush3.bf16.xpose.msra.mxu0 %v572_v24 }
  0x63   :  { %535 = vmatpush3.bf16.xpose.msra.mxu1 %v573_v25  ;;  %518 = vmatprep.subr.bf16.mxu0 %v574_v26 }
  0x64   :  { %536 = vmatprep.subr.bf16.mxu1 %v575_v27 }
  0x6a   :  { %519 = vmatpush3.bf16.xpose.msra.mxu0 %v576_v28 }
  0x6b   :  { %537 = vmatpush3.bf16.xpose.msra.mxu1 %v577_v29  ;;  %520 = vmatprep.subr.bf16.mxu0 %v578_v30 }
  0x6c   :  { %538 = vmatprep.subr.bf16.mxu1 %v579_v31 }
  0x72   :  { %521 = vmatpush3.bf16.xpose.msra.mxu0 %v580_v32 }
  0x73   :  { %539 = vmatpush3.bf16.xpose.msra.mxu1 %v581_v33 }
  0x79   :  { %523 = vmatmul.mubr.bf16.vlgmr.msra.gmra.mrb[0].mxu0 %v67_v19 }
  0x7a   :  { %541 = vmatmul.mubr.bf16.vlgmr.msra.gmra.mrb[0].mxu1 %v257_v20 }
 0x14c   :  { %v230_v41 = vpop.f32.mrb[0].mxu0 }
 0x14d   :  { %v420_v43 = vpop.f32.mrb[0].mxu1  ;;  %v232_v44 = vpop.f32.mrb[1].mxu0 }
 0x14e   :  { %v239_v45 = vcombine.low %v230_v41, %v232_v44  ;;  %v422_v46 = vpop.f32.mrb[1].mxu1  ;;  %v234_v47 = vpop.f32.mrb[2].mxu0 }
 0x14f   :  { %v429_v48 = vcombine.low %v420_v43, %v422_v46  ;;  %v424_v49 = vpop.f32.mrb[2].mxu1  ;;  %v235_v50 = vpop.f32.mrb[3].mxu0 }
 0x150   :  { %v246_v51 = vrot.slane %v239_v45, %v245_v42  ;;  %v425_v52 = vpop.f32.mrb[3].mxu1 }
 0x151   :  { %v436_v53 = vrot.slane %v429_v48, %v245_v42 }
 0x152   :  { %v253_v54 = vrot.slane %v246_v51, %v245_v42 }
 0x153   :  { %v443_v56 = vrot.slane %v436_v53, %v245_v42 }
 0x154   :  { %255 = vst.msk [vmem:[#allocation3] sm:$0x3] %vm754_vm0, %v253_v54 }
 0x155   :  { %v445_v57 = vadd.f32 %v443_v56, %v256_v55 }
 0x157   :  { %450 = vst.msk [vmem:[#allocation2] sm:$0x3] %vm754_vm0, %v445_v57 }
 0x15b   :  { %v455_v58 = vld [vmem:[#allocation3] sm:$0x3] }
 0x15e   :  { %v454_v59 = vld [vmem:[#allocation2] sm:$0x3] }
 0x15f   :  { %v456_v60 = vmul.f32 %v455_v58, %v454_v59 }
 0x161   :  { %457 = vst.msk [vmem:[#allocation10] sm:$0x3] %vm754_vm0, %v456_v60 }
 0x162   :  { %659 = shalt.err (!%p656_p0)
}
 0x163   :  { %s660_s5 = scalar_lea.hbm %s782_s4, 32 }
 0x164   :  { %p661_p1 = scmp.ne.s32.totalorder %s782_s4, %s660_s5  ;;  %p664_p2 = scmp.lt.u32.totalorder %s660_s5, %s782_s4 }
 0x166   :  { %p666_p3 = pnand %p664_p2, %p661_p1 }
 0x168   :  { %669 = shalt.err (!%p666_p3)
}
 0x169   :  { %467 = dma.vmem_to_hbm [thread:$0]  %s465_s26, 32, %s782_s4, [#allocation6]  }
 0x16a   :  { %674 = dma.done.wait [#allocation6], 32  }
 0x16b   :  { %675 = vsyncadd [#allocation6], 4294967264 }
 0x16c   :  { %471 = vsyncpa [#allocation5], 1 }
 0x16d   :  { %472 = vsyncpa [#allocation8], 1 }
 0x16e   :  { %473 = vsyncpa [#allocation6], 1 }

</bundles_post_ra>
